<compile_context>
chip_gen: v7x
topology: tpu7x:2x2x1
jax: 0.10.0
libtpu: 0.0.40
codegen_flags: <defaults>
</compile_context>

<pallas_src>
import jax
import jax.numpy as jnp
from jax.experimental import pallas as pl
from jax.experimental.pallas import tpu as pltpu

IN_FEATURES = 16
OUT_FEATURES = 32
PACK = 8                             # batch rows packed per lane-dense row
PACKED_IN = PACK * IN_FEATURES       # 128 (full lane width)
PACKED_OUT = PACK * OUT_FEATURES     # 256
FAST_PATH_MAX_ROWS = 512             # below this, plain fused XLA wins


def linear_clamp_kernel(x_ref, w_ref, b_ref, o_ref):
    # (tb,128) @ (128,256) on the MXU (f32 accumulate), bias + clamp on the VPU.
    y = jnp.dot(x_ref[...], w_ref[...], preferred_element_type=jnp.float32)
    y = y + b_ref[...]
    y = jnp.maximum(y, -1000.0)   # clamp_min
    y = jnp.minimum(y, 1000.0)    # clamp_max
    o_ref[...] = y.astype(o_ref.dtype)


def _round_up(n, m):
    return ((n + m - 1) // m) * m


def _packed_tile(bp):
    """Packed-row (B//8) tile size."""
    if bp <= 256:
        # Single block equal to the full extent (always a legal block shape).
        return bp
    if bp <= 2048:
        # At least 2 grid steps so v7x's second TensorCore is not idle.
        return _round_up(pl.cdiv(bp, 2), PACK)
    # Large batches: 1024 packed rows (= 8192 original rows); double-buffered
    # x+out tiles are ~3 MiB -> fits default scoped VMEM on v5e/v6e/v7x.
    return 1024


def _dense_ref(x, w_t, b):
    return jnp.clip(x @ w_t + b, -1000.0, 1000.0)


def pack_params(w_t, b):
    """(16,32) weight, (32,) bias -> lane-dense (128,256) weight, (1,256) bias.

    In a real model this is done once at parameter-load time.
    """
    w_bd = jnp.kron(jnp.eye(PACK, dtype=w_t.dtype), w_t)          # (128, 256)
    b_pk = jnp.tile(b.reshape(1, OUT_FEATURES), (1, PACK))         # (1, 256)
    return w_bd, b_pk


def _linear_clamp_packed(x, w_bd, b_pk):
    """x: (B, 16) with B % 8 == 0 -> (B, 32) via the lane-dense Pallas kernel."""
    B = x.shape[0]
    bp = B // PACK
    xp = x.reshape(bp, PACKED_IN)          # free: row-major contiguous
    tbp = _packed_tile(bp)
    grid = (pl.cdiv(bp, tbp),)             # last block may be partial -> masked

    cost = pl.CostEstimate(
        flops=2 * B * IN_FEATURES * OUT_FEATURES,
        transcendentals=0,
        bytes_accessed=4 * (B * IN_FEATURES + PACKED_IN * PACKED_OUT
                            + PACKED_OUT + B * OUT_FEATURES),
    )

    out = pl.pallas_call(
        linear_clamp_kernel,
        out_shape=jax.ShapeDtypeStruct((bp, PACKED_OUT), x.dtype),
        grid=grid,
        in_specs=[
            # x streams through the grid (double-buffered by the pipeline).
            pl.BlockSpec((tbp, PACKED_IN), lambda i: (i, 0)),
            # weight & bias are grid-invariant -> stay resident in VMEM.
            pl.BlockSpec((PACKED_IN, PACKED_OUT), lambda i: (0, 0)),
            pl.BlockSpec((1, PACKED_OUT), lambda i: (0, 0)),
        ],
        out_specs=pl.BlockSpec((tbp, PACKED_OUT), lambda i: (i, 0)),
        compiler_params=pltpu.CompilerParams(
            dimension_semantics=("parallel",),
        ),
        cost_estimate=cost,
    )(xp, w_bd, b_pk)

    return out.reshape(B, OUT_FEATURES)    # free: row-major contiguous


def linear_clamp(x, w_t, b):
    """x: (B, 16), w_t: (16, 32), b: (32,) -> clamp(x @ w_t + b, -1000, 1000)."""
    B = x.shape[0]
    if B < FAST_PATH_MAX_ROWS:
        # Tiny batches (incl. the module's shipped B=1): launch overhead
        # dominates any kernel; let XLA fuse the whole thing.
        return _dense_ref(x, w_t, b)

    w_bd, b_pk = pack_params(w_t, b)
    b_main = (B // PACK) * PACK
    out_main = _linear_clamp_packed(x[:b_main], w_bd, b_pk)
    if b_main == B:
        return out_main
    # Ragged (<8 row) batch tail: tiny plain-jnp path instead of padding and
    # re-writing the whole array.
    out_tail = _dense_ref(x[b_main:], w_t, b)
    return jnp.concatenate([out_main, out_tail], axis=0)


if __name__ == "__main__":
    key = jax.random.PRNGKey(0)
    kx1, kw, kb, kx2, kx3, kx4 = jax.random.split(key, 6)

    # Synthetic nn.Linear(16, 32) parameters (PyTorch weight layout is (OUT, IN)).
    w = jax.random.normal(kw, (OUT_FEATURES, IN_FEATURES), dtype=jnp.float32) * 0.1
    b = jax.random.normal(kb, (OUT_FEATURES,), dtype=jnp.float32) * 0.1
    w_t = w.T                                   # (16, 32) so we compute x @ w_t

    def torch_ref(x):
        return jnp.clip(x @ w.T + b, -1000.0, 1000.0)

    # Case 1: the module's shipped shape, x1 = randn(1, 16) -> fast path.
    x1 = jax.random.normal(kx1, (1, IN_FEATURES), dtype=jnp.float32)
    out1 = jax.block_until_ready(linear_clamp(x1, w_t, b))
    assert out1.shape == (1, OUT_FEATURES)
    assert jnp.allclose(out1, torch_ref(x1), atol=1e-5), "mismatch (B=1)"

    # Case 2: B=2000 -> Pallas path, single full-extent packed block (bp=250).
    x2 = jax.random.normal(kx2, (2000, IN_FEATURES), dtype=jnp.float32)
    out2 = jax.block_until_ready(linear_clamp(x2, w_t, b))
    assert out2.shape == (2000, OUT_FEATURES)
    assert jnp.allclose(out2, torch_ref(x2), atol=1e-4), "mismatch (B=2000)"

    # Case 3: B=4104 -> multi-step grid with a masked partial final block.
    x3 = jax.random.normal(kx3, (4104, IN_FEATURES), dtype=jnp.float32)
    out3 = jax.block_until_ready(linear_clamp(x3, w_t, b))
    assert out3.shape == (4104, OUT_FEATURES)
    assert jnp.allclose(out3, torch_ref(x3), atol=1e-4), "mismatch (B=4104)"

    # Case 4: B=4100 (not a multiple of 8) -> Pallas main + 4-row jnp tail.
    x4 = jax.random.normal(kx4, (4100, IN_FEATURES), dtype=jnp.float32)
    out4 = jax.block_until_ready(linear_clamp(x4, w_t, b))
    assert out4.shape == (4100, OUT_FEATURES)
    assert jnp.allclose(out4, torch_ref(x4), atol=1e-4), "mismatch (B=4100)"

    print("KERNEL_OK")
</pallas_src>

<mosaic_0001>
module attributes {stable_mosaic.version = 11 : i64} {
  func.func @linear_clamp_kernel(%arg0: i32, %arg1: memref<250x128xf32, #tpu.memory_space<vmem>>, %arg2: memref<128x256xf32, #tpu.memory_space<vmem>>, %arg3: memref<1x256xf32, #tpu.memory_space<vmem>>, %arg4: memref<250x256xf32, #tpu.memory_space<vmem>>) attributes {dimension_semantics = [#tpu.dimension_semantics<parallel>], iteration_bounds = array<i64: 1>, scalar_prefetch = 0 : i64, scratch_operands = 0 : i64, tpu.core_type = #tpu.core_type<tc>, window_params = [{transform_indices = @transform_0, window_bounds = array<i64: 250, 128>}, {pipeline_mode = #tpu.pipeline_mode<synchronous>, transform_indices = @transform_1, window_bounds = array<i64: 128, 256>}, {pipeline_mode = #tpu.pipeline_mode<synchronous>, transform_indices = @transform_2, window_bounds = array<i64: 1, 256>}, {transform_indices = @transform_3, window_bounds = array<i64: 250, 256>}]} {
    %c0 = arith.constant 0 : index
    %c0_0 = arith.constant 0 : index
    %0 = vector.load %arg1[%c0, %c0_0] : memref<250x128xf32, #tpu.memory_space<vmem>>, vector<250x128xf32>
    %c0_1 = arith.constant 0 : index
    %c0_2 = arith.constant 0 : index
    %1 = vector.load %arg2[%c0_1, %c0_2] : memref<128x256xf32, #tpu.memory_space<vmem>>, vector<128x256xf32>
    %cst = arith.constant dense<0.000000e+00> : vector<250x256xf32>
    %2 = tpu.matmul %0, %1, %cst {dimension_numbers = #tpu.dot_dimension_numbers<[1], [0], [0], [1], [0, 0, 1, 1], [], []>} : vector<250x128xf32>, vector<128x256xf32>, vector<250x256xf32> -> vector<250x256xf32>
    %c0_3 = arith.constant 0 : index
    %c0_4 = arith.constant 0 : index
    %3 = vector.load %arg3[%c0_3, %c0_4] : memref<1x256xf32, #tpu.memory_space<vmem>>, vector<1x256xf32>
    %4 = vector.broadcast %3 : vector<1x256xf32> to vector<250x256xf32>
    %5 = arith.addf %2, %4 : vector<250x256xf32>
    %cst_5 = arith.constant -1.000000e+03 : f32
    %6 = vector.broadcast %cst_5 : f32 to vector<250x256xf32>
    %7 = arith.maximumf %5, %6 : vector<250x256xf32>
    %cst_6 = arith.constant 1.000000e+03 : f32
    %8 = vector.broadcast %cst_6 : f32 to vector<250x256xf32>
    %9 = arith.minimumf %7, %8 : vector<250x256xf32>
    %c0_7 = arith.constant 0 : index
    %c0_8 = arith.constant 0 : index
    %10 = vector.load %arg4[%c0_7, %c0_8] : memref<250x256xf32, #tpu.memory_space<vmem>>, vector<250x256xf32>
    tpu.vector_store %arg4[%c0_7, %c0_8], %9 {strides = array<i32>} : memref<250x256xf32, #tpu.memory_space<vmem>>, vector<250x256xf32>,
    return
  }
  func.func @transform_0(%arg0: i32) -> (i32, i32) {
    %c0_i32 = arith.constant 0 : i32
    %c0_i32_0 = arith.constant 0 : i32
    return %arg0, %c0_i32 : i32, i32
  }
  func.func @transform_1(%arg0: i32) -> (i32, i32) {
    %c0_i32 = arith.constant 0 : i32
    %c0_i32_0 = arith.constant 0 : i32
    %c0_i32_1 = arith.constant 0 : i32
    return %c0_i32, %c0_i32_0 : i32, i32
  }
  func.func @transform_2(%arg0: i32) -> (i32, i32) {
    %c0_i32 = arith.constant 0 : i32
    %c0_i32_0 = arith.constant 0 : i32
    %c0_i32_1 = arith.constant 0 : i32
    return %c0_i32, %c0_i32_0 : i32, i32
  }
  func.func @transform_3(%arg0: i32) -> (i32, i32) {
    %c0_i32 = arith.constant 0 : i32
    %c0_i32_0 = arith.constant 0 : i32
    return %arg0, %c0_i32 : i32, i32
  }
}

</mosaic_0001>

<bundles_post_ra>
// kernel: tpu_custom_call.1
= control target key start
LH: loop header
LB: loop body
LE: loop exit
PB: predicated region body
PF: predicated region fallthrough
CT: control target
= control target key end

     0   :  { %8 = vsyncpa [#allocation3], 0  ;;  %s951_s0 = inlined_call_operand.hbm [shape: f32[250,128], index: 0, kind: input, shape index: {}]   ;;  %s952_s1 = inlined_call_operand.hbm [shape: f32[128,256], index: 1, kind: input, shape index: {}]   ;;  %s953_s2 = inlined_call_operand.vmem [shape: f32[1,256], index: 2, kind: input, shape index: {}]   ;;  %s954_s3 = inlined_call_operand.hbm [shape: f32[250,256], index: 3, kind: output, shape index: {}]  }
   0x1   :  { %9 = vsyncpa [#allocation6], 0 }
   0x2   :  { %10 = vsyncpa [#allocation4], 0  ;;  %s778_s12 = smov [#allocation2]   ;;  %s706_s16 = scalar_lea.hbm %s951_s0, 4096 }
   0x3   :  { %s16_s13 = sshll.u32 %s778_s12, 4  ;;  %p707_p0 = scmp.ne.s32.totalorder %s951_s0, %s706_s16  ;;  %s17_s13 = int_to_ptr.vmem [resolvable:$true] %s16_s13 }
   0x4   :  { %p710_p1 = scmp.lt.u32.totalorder %s706_s16, %s951_s0 }
   0x6   :  { %p712_p2 = pnand %p710_p1, %p707_p0 }
   0x8   :  { %715 = shalt.err (!%p712_p2)
}
   0x9   :  { %s716_s21 = scalar_lea.vmem %s17_s13, 4096  ;;  %p721_p4 = scmp.lt.s32.totalorder %s17_s13, %s17_s13 }
   0xa   :  { %p717_p3 = scmp.ne.s32.totalorder %s17_s13, %s716_s21  ;;  %p722_p5 = scmp.lt.s32.totalorder %s716_s21, %s716_s21 }
   0xc   :  { %p723_p6 = por %p722_p5, %p721_p4 }
   0xe   :  { %p724_p7 = pnand %p723_p6, %p717_p3 }
  0x10   :  { %727 = shalt.err (!%p724_p7)
}
  0x11   :  { %s779_s22 = smov 128   ;;  %s780_s23 = smov 8  }
  0x12   :  { %22 = dma.hbm_to_vmem [thread:$0]  %s951_s0, 4096, %s17_s13, [#allocation3], %s779_s22, %s779_s22, %s780_s23  }
  0x13   :  { %s781_s26 = smov [#allocation5]   ;;  %s728_s30 = scalar_lea.hbm %s952_s1, 4096 }
  0x14   :  { %s28_s27 = sshll.u32 %s781_s26, 4  ;;  %p729_p8 = scmp.ne.s32.totalorder %s952_s1, %s728_s30  ;;  %s29_s27 = int_to_ptr.vmem [resolvable:$true] %s28_s27 }
  0x15   :  { %p732_p9 = scmp.lt.u32.totalorder %s728_s30, %s952_s1 }
  0x17   :  { %p734_p10 = pnand %p732_p9, %p729_p8 }
  0x19   :  { %737 = shalt.err (!%p734_p10)
}
  0x1a   :  { %s738_s8 = scalar_lea.vmem %s29_s27, 4096  ;;  %p743_p12 = scmp.lt.s32.totalorder %s29_s27, %s29_s27 }
  0x1b   :  { %p739_p11 = scmp.ne.s32.totalorder %s29_s27, %s738_s8  ;;  %p744_p13 = scmp.lt.s32.totalorder %s738_s8, %s738_s8 }
  0x1d   :  { %p745_p0 = por %p744_p13, %p743_p12 }
  0x1f   :  { %p746_p1 = pnand %p745_p0, %p739_p11 }
  0x21   :  { %749 = shalt.err (!%p746_p1)
}
  0x22   :  { %s782_s0 = smov 256   ;;  %s783_s9 = smov 16  }
  0x23   :  { %34 = dma.hbm_to_vmem [thread:$0]  %s952_s1, 4096, %s29_s27, [#allocation6], %s782_s0, %s782_s0, %s783_s9  }
  0x24   :  { %772 = dma.done.wait [#allocation3], 4096  }
  0x25   :  { %773 = vsyncadd [#allocation3], 4294963200 }
  0x26   :  { %774 = dma.done.wait [#allocation6], 4096  }
  0x27   :  { %775 = vsyncadd [#allocation6], 4294963200  ;;  %v784_v0 = vmov 0.0   ;;  %v76_v1 = vld [vmem:[#allocation5 + $0x8] sm:$0xff]  ;;  %v78_v2 = vld [vmem:[#allocation5 + $0x18] sm:$0xff] }
  0x28   :  { %183 = vmatprep.mubr.f32.mxu0 %v784_v0  ;;  %279 = vmatprep.mubr.f32.mxu1 %v784_v0  ;;  %v75_v3 = vld [vmem:[#allocation5] sm:$0xff]  ;;  %v650_v4 = vpack.c.bf16 %v78_v2, %v76_v1  ;;  %v77_v5 = vld [vmem:[#allocation5 + $0x10] sm:$0xff]  ;;  %v80_v6 = vld [vmem:[#allocation5 + $0x28] sm:$0xff] }
  0x29   :  { %v82_v7 = vld [vmem:[#allocation5 + $0x38] sm:$0xff]  ;;  %v652_v8 = vpack.c.bf16 %v77_v5, %v75_v3  ;;  %v79_v10 = vld [vmem:[#allocation5 + $0x20] sm:$0xff]  ;;  %v81_v11 = vld [vmem:[#allocation5 + $0x30] sm:$0xff] }
  0x2a   :  { %v654_v9 = vpack.c.bf16 %v82_v7, %v80_v6  ;;  %v84_v12 = vld [vmem:[#allocation5 + $0x48] sm:$0xff]  ;;  %651 = vmatprep.subr.bf16.mxu0 %v650_v4  ;;  %682 = vmatprep.subr.bf16.mxu1 %v650_v4  ;;  %v86_v13 = vld [vmem:[#allocation5 + $0x58] sm:$0xff]  ;;  %v656_v14 = vpack.c.bf16 %v81_v11, %v79_v10  ;;  %v83_v16 = vld [vmem:[#allocation5 + $0x40] sm:$0xff] }
  0x2b   :  { %653 = vmatpush1.bf16.msra.mxu0 %v652_v8  ;;  %690 = vmatpush1.bf16.msra.mxu1 %v652_v8  ;;  %v658_v15 = vpack.c.bf16 %v86_v13, %v84_v12  ;;  %v85_v17 = vld [vmem:[#allocation5 + $0x50] sm:$0xff]  ;;  %v88_v18 = vld [vmem:[#allocation5 + $0x68] sm:$0xff]  ;;  %v90_v19 = vld [vmem:[#allocation5 + $0x78] sm:$0xff] }
  0x2c   :  { %655 = vmatprep.subr.bf16.mxu0 %v654_v9  ;;  %683 = vmatprep.subr.bf16.mxu1 %v654_v9  ;;  %v660_v20 = vpack.c.bf16 %v85_v17, %v83_v16  ;;  %v662_v21 = vpack.c.bf16 %v90_v19, %v88_v18  ;;  %v87_v22 = vld [vmem:[#allocation5 + $0x60] sm:$0xff]  ;;  %v89_v23 = vld [vmem:[#allocation5 + $0x70] sm:$0xff]  ;;  %v92_v24 = vld [vmem:[#allocation5 + $0x88] sm:$0xff]  ;;  %v109_v18 = vlaneseq }
  0x2d   :  { %v94_v25 = vld [vmem:[#allocation5 + $0x98] sm:$0xff]  ;;  %v664_v26 = vpack.c.bf16 %v89_v23, %v87_v22  ;;  %v91_v28 = vld [vmem:[#allocation5 + $0x80] sm:$0xff]  ;;  %v93_v29 = vld [vmem:[#allocation5 + $0x90] sm:$0xff] }
  0x2e   :  { %v666_v27 = vpack.c.bf16 %v94_v25, %v92_v24  ;;  %v96_v30 = vld [vmem:[#allocation5 + $0xa8] sm:$0xff]  ;;  %v98_v31 = vld [vmem:[#allocation5 + $0xb8] sm:$0xff]  ;;  %v668_v32 = vpack.c.bf16 %v93_v29, %v91_v28  ;;  %v95_v34 = vld [vmem:[#allocation5 + $0xa0] sm:$0xff]  ;;  %v110_v19 = vshrl.u32 %v109_v18, 7 }
  0x2f   :  { %657 = vmatpush1.bf16.msra.mxu0 %v656_v14  ;;  %691 = vmatpush1.bf16.msra.mxu1 %v656_v14  ;;  %v670_v33 = vpack.c.bf16 %v98_v31, %v96_v30  ;;  %v97_v35 = vld [vmem:[#allocation5 + $0xb0] sm:$0xff]  ;;  %v100_v36 = vld [vmem:[#allocation5 + $0xc8] sm:$0xff]  ;;  %v102_v37 = vld [vmem:[#allocation5 + $0xd8] sm:$0xff] }
  0x30   :  { %659 = vmatprep.subr.bf16.mxu0 %v658_v15  ;;  %684 = vmatprep.subr.bf16.mxu1 %v658_v15  ;;  %v672_v38 = vpack.c.bf16 %v97_v35, %v95_v34  ;;  %v674_v39 = vpack.c.bf16 %v102_v37, %v100_v36  ;;  %v99_v40 = vld [vmem:[#allocation5 + $0xc0] sm:$0xff]  ;;  %v101_v41 = vld [vmem:[#allocation5 + $0xd0] sm:$0xff]  ;;  %v104_v42 = vld [vmem:[#allocation5 + $0xe8] sm:$0xff]  ;;  %v115_v22 = vsub.s32 1, %v110_v19 }
  0x31   :  { %v106_v43 = vld [vmem:[#allocation5 + $0xf8] sm:$0xff]  ;;  %v676_v44 = vpack.c.bf16 %v101_v41, %v99_v40  ;;  %v103_v46 = vld [vmem:[#allocation5 + $0xe0] sm:$0xff]  ;;  %v105_v47 = vld [vmem:[#allocation5 + $0xf0] sm:$0xff] }
  0x32   :  { %v678_v45 = vpack.c.bf16 %v106_v43, %v104_v42  ;;  %v680_v48 = vpack.c.bf16 %v105_v47, %v103_v46  ;;  %v43_v49 = vld [vmem:[#allocation2] sm:$0xff]  ;;  %v44_v51 = vld [vmem:[#allocation2 + $0x8] sm:$0xff]  ;;  %v45_v53 = vld [vmem:[#allocation2 + $0x10] sm:$0xff] }
  0x33   :  { %661 = vmatpush1.bf16.msra.mxu0 %v660_v20  ;;  %692 = vmatpush1.bf16.msra.mxu1 %v660_v20  ;;  %v59_v50 = vld [vmem:[#allocation2 + $0x80] sm:$0xff]  ;;  %v60_v52 = vld [vmem:[#allocation2 + $0x88] sm:$0xff]  ;;  %v61_v54 = vld [vmem:[#allocation2 + $0x90] sm:$0xff]  ;;  %v111_v20 = vsub.s32 0, %v110_v19 }
  0x34   :  { %663 = vmatprep.subr.bf16.mxu0 %v662_v21  ;;  %685 = vmatprep.subr.bf16.mxu1 %v662_v21  ;;  %v46_v55 = vld [vmem:[#allocation2 + $0x18] sm:$0xff]  ;;  %v47_v57 = vld [vmem:[#allocation2 + $0x20] sm:$0xff]  ;;  %v48_v59 = vld [vmem:[#allocation2 + $0x28] sm:$0xff] }
  0x35   :  { %v62_v56 = vld [vmem:[#allocation2 + $0x98] sm:$0xff]  ;;  %v63_v58 = vld [vmem:[#allocation2 + $0xa0] sm:$0xff]  ;;  %v64_v60 = vld [vmem:[#allocation2 + $0xa8] sm:$0xff] }
  0x36   :  { %v49_v61 = vld [vmem:[#allocation2 + $0x30] sm:$0xff]  ;;  %v50_v63 = vld [vmem:[#allocation2 + $0x38] sm:$0xff]  ;;  %v51_v2 = vld [vmem:[#allocation2 + $0x40] sm:$0xff] }
  0x37   :  { %665 = vmatpush1.bf16.msra.mxu0 %v664_v26  ;;  %693 = vmatpush1.bf16.msra.mxu1 %v664_v26  ;;  %v65_v62 = vld [vmem:[#allocation2 + $0xb0] sm:$0xff]  ;;  %v66_v1 = vld [vmem:[#allocation2 + $0xb8] sm:$0xff]  ;;  %v67_v3 = vld [vmem:[#allocation2 + $0xc0] sm:$0xff] }
  0x38   :  { %667 = vmatprep.subr.bf16.mxu0 %v666_v27  ;;  %686 = vmatprep.subr.bf16.mxu1 %v666_v27  ;;  %v52_v4 = vld [vmem:[#allocation2 + $0x48] sm:$0xff]  ;;  %v53_v6 = vld [vmem:[#allocation2 + $0x50] sm:$0xff]  ;;  %v54_v8 = vld [vmem:[#allocation2 + $0x58] sm:$0xff] }
  0x39   :  { %v68_v5 = vld [vmem:[#allocation2 + $0xc8] sm:$0xff]  ;;  %v69_v7 = vld [vmem:[#allocation2 + $0xd0] sm:$0xff]  ;;  %v70_v9 = vld [vmem:[#allocation2 + $0xd8] sm:$0xff] }
  0x3a   :  { %v55_v10 = vld [vmem:[#allocation2 + $0x60] sm:$0xff]  ;;  %v56_v12 = vld [vmem:[#allocation2 + $0x68] sm:$0xff]  ;;  %v57_v14 = vld [vmem:[#allocation2 + $0x70] sm:$0xff] }
  0x3b   :  { %669 = vmatpush1.bf16.msra.mxu0 %v668_v32  ;;  %694 = vmatpush1.bf16.msra.mxu1 %v668_v32  ;;  %v71_v11 = vld [vmem:[#allocation2 + $0xe0] sm:$0xff]  ;;  %v72_v13 = vld [vmem:[#allocation2 + $0xe8] sm:$0xff]  ;;  %v73_v15 = vld [vmem:[#allocation2 + $0xf0] sm:$0xff] }
  0x3c   :  { %671 = vmatprep.subr.bf16.mxu0 %v670_v33  ;;  %687 = vmatprep.subr.bf16.mxu1 %v670_v33  ;;  %v58_v16 = vld [vmem:[#allocation2 + $0x78] sm:$0xff]  ;;  %v107_v21 = vld [vmem:[%s953_s2] sm:$0x3]  ;;  %s785_s2 = smov [#allocation7]  }
  0x3d   :  { %v74_v17 = vld [vmem:[#allocation2 + $0xf8] sm:$0x3]  ;;  %v868_v23 = vrot.slane %v107_v21, %v111_v20  ;;  %v870_v24 = vrot.slane %v107_v21, %v115_v22  ;;  %s573_s13 = sshll.u32 %s785_s2, 4  ;;  %s574_s13 = int_to_ptr.vmem [resolvable:$true] %s573_s13 }
  0x3e   :  { %s750_s14 = scalar_lea.vmem %s574_s13, 8192  ;;  %p755_p3 = scmp.lt.s32.totalorder %s574_s13, %s574_s13 }
  0x3f   :  { %673 = vmatpush1.bf16.msra.mxu0 %v672_v38  ;;  %695 = vmatpush1.bf16.msra.mxu1 %v672_v38  ;;  %p751_p2 = scmp.ne.s32.totalorder %s574_s13, %s750_s14  ;;  %p756_p4 = scmp.lt.s32.totalorder %s750_s14, %s750_s14 }
  0x40   :  { %675 = vmatprep.subr.bf16.mxu0 %v674_v39  ;;  %688 = vmatprep.subr.bf16.mxu1 %v674_v39 }
  0x41   :  { %p757_p5 = por %p756_p4, %p755_p3 }
  0x43   :  { %677 = vmatpush1.bf16.msra.mxu0 %v676_v44  ;;  %696 = vmatpush1.bf16.msra.mxu1 %v676_v44  ;;  %p758_p6 = pnand %p757_p5, %p751_p2 }
  0x44   :  { %679 = vmatprep.subr.bf16.mxu0 %v678_v45  ;;  %689 = vmatprep.subr.bf16.mxu1 %v678_v45 }
  0x47   :  { %681 = vmatpush1.bf16.msra.mxu0 %v680_v48  ;;  %697 = vmatpush1.bf16.msra.mxu1 %v680_v48 }
  0x4a   :  { %184 = vmatmul.mubr.f32.vlgmr.msra.gmra.mrb[0].mxu0 %v43_v49  ;;  %280 = vmatmul.mubr.f32.vlgmr.msra.gmra.mrb[0].mxu1 %v59_v50 }
  0x4b   :  { %189 = vmatprep.mubr.f32.mxu0 %v784_v0  ;;  %285 = vmatprep.mubr.f32.mxu1 %v784_v0 }
  0x4e   :  { %190 = vmatmul.mubr.f32.gmra.mrb[2].mxu0 %v44_v51  ;;  %286 = vmatmul.mubr.f32.gmra.mrb[2].mxu1 %v60_v52 }
  0x4f   :  { %195 = vmatprep.mubr.f32.mxu0 %v784_v0  ;;  %291 = vmatprep.mubr.f32.mxu1 %v784_v0 }
  0x52   :  { %196 = vmatmul.mubr.f32.gmra.mrb[4].mxu0 %v45_v53  ;;  %292 = vmatmul.mubr.f32.gmra.mrb[4].mxu1 %v61_v54 }
  0x53   :  { %201 = vmatprep.mubr.f32.mxu0 %v784_v0  ;;  %297 = vmatprep.mubr.f32.mxu1 %v784_v0 }
  0x56   :  { %202 = vmatmul.mubr.f32.gmra.mrb[6].mxu0 %v46_v55  ;;  %298 = vmatmul.mubr.f32.gmra.mrb[6].mxu1 %v62_v56 }
  0x57   :  { %207 = vmatprep.mubr.f32.mxu0 %v784_v0  ;;  %303 = vmatprep.mubr.f32.mxu1 %v784_v0 }
  0x5a   :  { %208 = vmatmul.mubr.f32.gmra.mrb[8].mxu0 %v47_v57  ;;  %304 = vmatmul.mubr.f32.gmra.mrb[8].mxu1 %v63_v58 }
  0x5b   :  { %213 = vmatprep.mubr.f32.mxu0 %v784_v0  ;;  %309 = vmatprep.mubr.f32.mxu1 %v784_v0 }
  0x5e   :  { %214 = vmatmul.mubr.f32.gmra.mrb[10].mxu0 %v48_v59  ;;  %310 = vmatmul.mubr.f32.gmra.mrb[10].mxu1 %v64_v60 }
  0x5f   :  { %219 = vmatprep.mubr.f32.mxu0 %v784_v0  ;;  %315 = vmatprep.mubr.f32.mxu1 %v784_v0 }
  0x62   :  { %220 = vmatmul.mubr.f32.gmra.mrb[12].mxu0 %v49_v61  ;;  %316 = vmatmul.mubr.f32.gmra.mrb[12].mxu1 %v65_v62 }
  0x63   :  { %225 = vmatprep.mubr.f32.mxu0 %v784_v0  ;;  %321 = vmatprep.mubr.f32.mxu1 %v784_v0 }
  0x66   :  { %226 = vmatmul.mubr.f32.gmra.mrb[14].mxu0 %v50_v63  ;;  %322 = vmatmul.mubr.f32.gmra.mrb[14].mxu1 %v66_v1 }
  0x67   :  { %231 = vmatprep.mubr.f32.mxu0 %v784_v0  ;;  %327 = vmatprep.mubr.f32.mxu1 %v784_v0 }
  0x6a   :  { %232 = vmatmul.mubr.f32.gmra.mrb[16].mxu0 %v51_v2  ;;  %328 = vmatmul.mubr.f32.gmra.mrb[16].mxu1 %v67_v3 }
  0x6b   :  { %237 = vmatprep.mubr.f32.mxu0 %v784_v0  ;;  %333 = vmatprep.mubr.f32.mxu1 %v784_v0 }
  0x6e   :  { %238 = vmatmul.mubr.f32.gmra.mrb[18].mxu0 %v52_v4  ;;  %334 = vmatmul.mubr.f32.gmra.mrb[18].mxu1 %v68_v5 }
  0x6f   :  { %243 = vmatprep.mubr.f32.mxu0 %v784_v0  ;;  %339 = vmatprep.mubr.f32.mxu1 %v784_v0 }
  0x72   :  { %244 = vmatmul.mubr.f32.gmra.mrb[20].mxu0 %v53_v6  ;;  %340 = vmatmul.mubr.f32.gmra.mrb[20].mxu1 %v69_v7 }
  0x73   :  { %249 = vmatprep.mubr.f32.mxu0 %v784_v0  ;;  %345 = vmatprep.mubr.f32.mxu1 %v784_v0 }
  0x76   :  { %250 = vmatmul.mubr.f32.gmra.mrb[22].mxu0 %v54_v8  ;;  %346 = vmatmul.mubr.f32.gmra.mrb[22].mxu1 %v70_v9 }
  0x77   :  { %255 = vmatprep.mubr.f32.mxu0 %v784_v0  ;;  %351 = vmatprep.mubr.f32.mxu1 %v784_v0 }
  0x7a   :  { %256 = vmatmul.mubr.f32.gmra.mrb[24].mxu0 %v55_v10  ;;  %352 = vmatmul.mubr.f32.gmra.mrb[24].mxu1 %v71_v11 }
  0x7b   :  { %261 = vmatprep.mubr.f32.mxu0 %v784_v0  ;;  %357 = vmatprep.mubr.f32.mxu1 %v784_v0 }
  0x7e   :  { %262 = vmatmul.mubr.f32.gmra.mrb[26].mxu0 %v56_v12  ;;  %358 = vmatmul.mubr.f32.gmra.mrb[26].mxu1 %v72_v13 }
  0x7f   :  { %267 = vmatprep.mubr.f32.mxu0 %v784_v0  ;;  %363 = vmatprep.mubr.f32.mxu1 %v784_v0 }
  0x82   :  { %268 = vmatmul.mubr.f32.gmra.mrb[28].mxu0 %v57_v14  ;;  %364 = vmatmul.mubr.f32.gmra.mrb[28].mxu1 %v73_v15 }
  0x83   :  { %273 = vmatprep.mubr.f32.mxu0 %v784_v0  ;;  %369 = vmatprep.mubr.f32.mxu1 %v784_v0 }
  0x86   :  { %274 = vmatmul.mubr.f32.gmra.mrb[30].mxu0 %v58_v16  ;;  %370 = vmatmul.mubr.f32.gmra.mrb[30].mxu1 %v74_v17 }
 0x11d   :  { %v185_v25 = vpop.f32.mrb[0].mxu0  ;;  %v281_v26 = vpop.f32.mrb[0].mxu1 }
 0x11e   :  { %v186_v0 = vadd.f32 %v185_v25, %v868_v23  ;;  %v282_v27 = vadd.f32 %v281_v26, %v868_v23  ;;  %v187_v28 = vpop.f32.mrb[1].mxu0  ;;  %v283_v29 = vpop.f32.mrb[1].mxu1 }
 0x11f   :  { %v188_v30 = vadd.f32 %v187_v28, %v870_v24  ;;  %v284_v31 = vadd.f32 %v283_v29, %v870_v24 }
 0x120   :  { %v586_v32 = vclamps-f32 %v186_v0, 1000.0  ;;  %v618_v33 = vclamps-f32 %v282_v27, 1000.0 }
 0x121   :  { %v587_v34 = vclamps-f32 %v188_v30, 1000.0  ;;  %v619_v35 = vclamps-f32 %v284_v31, 1000.0  ;;  %v191_v36 = vpop.f32.mrb[2].mxu0  ;;  %v287_v37 = vpop.f32.mrb[2].mxu1 }
 0x122   :  { %504 = vst [vmem:[#allocation7] sm:$0xff] %v586_v32  ;;  %536 = vst [vmem:[#allocation7 + $0x100] sm:$0xff] %v618_v33  ;;  %v192_v38 = vadd.f32 %v191_v36, %v868_v23  ;;  %v288_v39 = vadd.f32 %v287_v37, %v868_v23  ;;  %v193_v40 = vpop.f32.mrb[3].mxu0  ;;  %v289_v41 = vpop.f32.mrb[3].mxu1 }
 0x123   :  { %505 = vst [vmem:[#allocation7 + $0x8] sm:$0xff] %v587_v34  ;;  %537 = vst [vmem:[#allocation7 + $0x108] sm:$0xff] %v619_v35  ;;  %v194_v42 = vadd.f32 %v193_v40, %v870_v24  ;;  %v290_v43 = vadd.f32 %v289_v41, %v870_v24 }
 0x124   :  { %v588_v44 = vclamps-f32 %v192_v38, 1000.0  ;;  %v620_v45 = vclamps-f32 %v288_v39, 1000.0 }
 0x125   :  { %v589_v46 = vclamps-f32 %v194_v42, 1000.0  ;;  %v621_v47 = vclamps-f32 %v290_v43, 1000.0  ;;  %v197_v48 = vpop.f32.mrb[4].mxu0  ;;  %v293_v49 = vpop.f32.mrb[4].mxu1 }
 0x126   :  { %506 = vst [vmem:[#allocation7 + $0x10] sm:$0xff] %v588_v44  ;;  %538 = vst [vmem:[#allocation7 + $0x110] sm:$0xff] %v620_v45  ;;  %v198_v50 = vadd.f32 %v197_v48, %v868_v23  ;;  %v294_v51 = vadd.f32 %v293_v49, %v868_v23  ;;  %v199_v52 = vpop.f32.mrb[5].mxu0  ;;  %v295_v53 = vpop.f32.mrb[5].mxu1 }
 0x127   :  { %507 = vst [vmem:[#allocation7 + $0x18] sm:$0xff] %v589_v46  ;;  %539 = vst [vmem:[#allocation7 + $0x118] sm:$0xff] %v621_v47  ;;  %v200_v54 = vadd.f32 %v199_v52, %v870_v24  ;;  %v296_v55 = vadd.f32 %v295_v53, %v870_v24 }
 0x128   :  { %v590_v56 = vclamps-f32 %v198_v50, 1000.0  ;;  %v622_v57 = vclamps-f32 %v294_v51, 1000.0 }
 0x129   :  { %v591_v58 = vclamps-f32 %v200_v54, 1000.0  ;;  %v623_v59 = vclamps-f32 %v296_v55, 1000.0  ;;  %v203_v60 = vpop.f32.mrb[6].mxu0  ;;  %v299_v61 = vpop.f32.mrb[6].mxu1 }
 0x12a   :  { %508 = vst [vmem:[#allocation7 + $0x20] sm:$0xff] %v590_v56  ;;  %540 = vst [vmem:[#allocation7 + $0x120] sm:$0xff] %v622_v57  ;;  %v204_v62 = vadd.f32 %v203_v60, %v868_v23  ;;  %v300_v63 = vadd.f32 %v299_v61, %v868_v23  ;;  %v205_v1 = vpop.f32.mrb[7].mxu0  ;;  %v301_v2 = vpop.f32.mrb[7].mxu1 }
 0x12b   :  { %509 = vst [vmem:[#allocation7 + $0x28] sm:$0xff] %v591_v58  ;;  %541 = vst [vmem:[#allocation7 + $0x128] sm:$0xff] %v623_v59  ;;  %v206_v3 = vadd.f32 %v205_v1, %v870_v24  ;;  %v302_v4 = vadd.f32 %v301_v2, %v870_v24 }
 0x12c   :  { %v592_v5 = vclamps-f32 %v204_v62, 1000.0  ;;  %v624_v6 = vclamps-f32 %v300_v63, 1000.0 }
 0x12d   :  { %v593_v7 = vclamps-f32 %v206_v3, 1000.0  ;;  %v625_v8 = vclamps-f32 %v302_v4, 1000.0  ;;  %v209_v9 = vpop.f32.mrb[8].mxu0  ;;  %v305_v10 = vpop.f32.mrb[8].mxu1 }
 0x12e   :  { %510 = vst [vmem:[#allocation7 + $0x30] sm:$0xff] %v592_v5  ;;  %542 = vst [vmem:[#allocation7 + $0x130] sm:$0xff] %v624_v6  ;;  %v210_v11 = vadd.f32 %v209_v9, %v868_v23  ;;  %v306_v12 = vadd.f32 %v305_v10, %v868_v23  ;;  %v211_v13 = vpop.f32.mrb[9].mxu0  ;;  %v307_v14 = vpop.f32.mrb[9].mxu1 }
 0x12f   :  { %511 = vst [vmem:[#allocation7 + $0x38] sm:$0xff] %v593_v7  ;;  %543 = vst [vmem:[#allocation7 + $0x138] sm:$0xff] %v625_v8  ;;  %v212_v15 = vadd.f32 %v211_v13, %v870_v24  ;;  %v308_v16 = vadd.f32 %v307_v14, %v870_v24 }
 0x130   :  { %v594_v17 = vclamps-f32 %v210_v11, 1000.0  ;;  %v626_v18 = vclamps-f32 %v306_v12, 1000.0 }
 0x131   :  { %v595_v19 = vclamps-f32 %v212_v15, 1000.0  ;;  %v627_v20 = vclamps-f32 %v308_v16, 1000.0  ;;  %v215_v21 = vpop.f32.mrb[10].mxu0  ;;  %v311_v22 = vpop.f32.mrb[10].mxu1 }
 0x132   :  { %512 = vst [vmem:[#allocation7 + $0x40] sm:$0xff] %v594_v17  ;;  %544 = vst [vmem:[#allocation7 + $0x140] sm:$0xff] %v626_v18  ;;  %v216_v25 = vadd.f32 %v215_v21, %v868_v23  ;;  %v312_v26 = vadd.f32 %v311_v22, %v868_v23  ;;  %v217_v0 = vpop.f32.mrb[11].mxu0  ;;  %v313_v27 = vpop.f32.mrb[11].mxu1 }
 0x133   :  { %513 = vst [vmem:[#allocation7 + $0x48] sm:$0xff] %v595_v19  ;;  %545 = vst [vmem:[#allocation7 + $0x148] sm:$0xff] %v627_v20  ;;  %v218_v28 = vadd.f32 %v217_v0, %v870_v24  ;;  %v314_v29 = vadd.f32 %v313_v27, %v870_v24 }
 0x134   :  { %v596_v30 = vclamps-f32 %v216_v25, 1000.0  ;;  %v628_v31 = vclamps-f32 %v312_v26, 1000.0 }
 0x135   :  { %v597_v32 = vclamps-f32 %v218_v28, 1000.0  ;;  %v629_v33 = vclamps-f32 %v314_v29, 1000.0  ;;  %v221_v34 = vpop.f32.mrb[12].mxu0  ;;  %v317_v35 = vpop.f32.mrb[12].mxu1 }
 0x136   :  { %514 = vst [vmem:[#allocation7 + $0x50] sm:$0xff] %v596_v30  ;;  %546 = vst [vmem:[#allocation7 + $0x150] sm:$0xff] %v628_v31  ;;  %v222_v36 = vadd.f32 %v221_v34, %v868_v23  ;;  %v318_v37 = vadd.f32 %v317_v35, %v868_v23  ;;  %v223_v38 = vpop.f32.mrb[13].mxu0  ;;  %v319_v39 = vpop.f32.mrb[13].mxu1 }
 0x137   :  { %515 = vst [vmem:[#allocation7 + $0x58] sm:$0xff] %v597_v32  ;;  %547 = vst [vmem:[#allocation7 + $0x158] sm:$0xff] %v629_v33  ;;  %v224_v40 = vadd.f32 %v223_v38, %v870_v24  ;;  %v320_v41 = vadd.f32 %v319_v39, %v870_v24 }
 0x138   :  { %v598_v42 = vclamps-f32 %v222_v36, 1000.0  ;;  %v630_v43 = vclamps-f32 %v318_v37, 1000.0 }
 0x139   :  { %v599_v44 = vclamps-f32 %v224_v40, 1000.0  ;;  %v631_v45 = vclamps-f32 %v320_v41, 1000.0  ;;  %v227_v46 = vpop.f32.mrb[14].mxu0  ;;  %v323_v47 = vpop.f32.mrb[14].mxu1 }
 0x13a   :  { %516 = vst [vmem:[#allocation7 + $0x60] sm:$0xff] %v598_v42  ;;  %548 = vst [vmem:[#allocation7 + $0x160] sm:$0xff] %v630_v43  ;;  %v228_v48 = vadd.f32 %v227_v46, %v868_v23  ;;  %v324_v49 = vadd.f32 %v323_v47, %v868_v23  ;;  %v229_v50 = vpop.f32.mrb[15].mxu0  ;;  %v325_v51 = vpop.f32.mrb[15].mxu1 }
 0x13b   :  { %517 = vst [vmem:[#allocation7 + $0x68] sm:$0xff] %v599_v44  ;;  %549 = vst [vmem:[#allocation7 + $0x168] sm:$0xff] %v631_v45  ;;  %v230_v52 = vadd.f32 %v229_v50, %v870_v24  ;;  %v326_v53 = vadd.f32 %v325_v51, %v870_v24 }
 0x13c   :  { %v600_v54 = vclamps-f32 %v228_v48, 1000.0  ;;  %v632_v55 = vclamps-f32 %v324_v49, 1000.0 }
 0x13d   :  { %v601_v56 = vclamps-f32 %v230_v52, 1000.0  ;;  %v633_v57 = vclamps-f32 %v326_v53, 1000.0  ;;  %v233_v58 = vpop.f32.mrb[16].mxu0  ;;  %v329_v59 = vpop.f32.mrb[16].mxu1 }
 0x13e   :  { %518 = vst [vmem:[#allocation7 + $0x70] sm:$0xff] %v600_v54  ;;  %550 = vst [vmem:[#allocation7 + $0x170] sm:$0xff] %v632_v55  ;;  %v234_v60 = vadd.f32 %v233_v58, %v868_v23  ;;  %v330_v61 = vadd.f32 %v329_v59, %v868_v23  ;;  %v235_v62 = vpop.f32.mrb[17].mxu0  ;;  %v331_v63 = vpop.f32.mrb[17].mxu1 }
 0x13f   :  { %519 = vst [vmem:[#allocation7 + $0x78] sm:$0xff] %v601_v56  ;;  %551 = vst [vmem:[#allocation7 + $0x178] sm:$0xff] %v633_v57  ;;  %v236_v1 = vadd.f32 %v235_v62, %v870_v24  ;;  %v332_v2 = vadd.f32 %v331_v63, %v870_v24 }
 0x140   :  { %v602_v3 = vclamps-f32 %v234_v60, 1000.0  ;;  %v634_v4 = vclamps-f32 %v330_v61, 1000.0 }
 0x141   :  { %v603_v5 = vclamps-f32 %v236_v1, 1000.0  ;;  %v635_v6 = vclamps-f32 %v332_v2, 1000.0  ;;  %v239_v7 = vpop.f32.mrb[18].mxu0  ;;  %v335_v8 = vpop.f32.mrb[18].mxu1 }
 0x142   :  { %520 = vst [vmem:[#allocation7 + $0x80] sm:$0xff] %v602_v3  ;;  %552 = vst [vmem:[#allocation7 + $0x180] sm:$0xff] %v634_v4  ;;  %v240_v9 = vadd.f32 %v239_v7, %v868_v23  ;;  %v336_v10 = vadd.f32 %v335_v8, %v868_v23  ;;  %v241_v11 = vpop.f32.mrb[19].mxu0  ;;  %v337_v12 = vpop.f32.mrb[19].mxu1 }
 0x143   :  { %521 = vst [vmem:[#allocation7 + $0x88] sm:$0xff] %v603_v5  ;;  %553 = vst [vmem:[#allocation7 + $0x188] sm:$0xff] %v635_v6  ;;  %v242_v13 = vadd.f32 %v241_v11, %v870_v24  ;;  %v338_v14 = vadd.f32 %v337_v12, %v870_v24 }
 0x144   :  { %v604_v15 = vclamps-f32 %v240_v9, 1000.0  ;;  %v636_v16 = vclamps-f32 %v336_v10, 1000.0 }
 0x145   :  { %v605_v17 = vclamps-f32 %v242_v13, 1000.0  ;;  %v637_v18 = vclamps-f32 %v338_v14, 1000.0  ;;  %v245_v19 = vpop.f32.mrb[20].mxu0  ;;  %v341_v20 = vpop.f32.mrb[20].mxu1 }
 0x146   :  { %522 = vst [vmem:[#allocation7 + $0x90] sm:$0xff] %v604_v15  ;;  %554 = vst [vmem:[#allocation7 + $0x190] sm:$0xff] %v636_v16  ;;  %v246_v21 = vadd.f32 %v245_v19, %v868_v23  ;;  %v342_v22 = vadd.f32 %v341_v20, %v868_v23  ;;  %v247_v25 = vpop.f32.mrb[21].mxu0  ;;  %v343_v26 = vpop.f32.mrb[21].mxu1 }
 0x147   :  { %523 = vst [vmem:[#allocation7 + $0x98] sm:$0xff] %v605_v17  ;;  %555 = vst [vmem:[#allocation7 + $0x198] sm:$0xff] %v637_v18  ;;  %v248_v0 = vadd.f32 %v247_v25, %v870_v24  ;;  %v344_v27 = vadd.f32 %v343_v26, %v870_v24 }
 0x148   :  { %v606_v28 = vclamps-f32 %v246_v21, 1000.0  ;;  %v638_v29 = vclamps-f32 %v342_v22, 1000.0 }
 0x149   :  { %v607_v30 = vclamps-f32 %v248_v0, 1000.0  ;;  %v639_v31 = vclamps-f32 %v344_v27, 1000.0  ;;  %v251_v32 = vpop.f32.mrb[22].mxu0  ;;  %v347_v33 = vpop.f32.mrb[22].mxu1 }
 0x14a   :  { %524 = vst [vmem:[#allocation7 + $0xa0] sm:$0xff] %v606_v28  ;;  %556 = vst [vmem:[#allocation7 + $0x1a0] sm:$0xff] %v638_v29  ;;  %v252_v34 = vadd.f32 %v251_v32, %v868_v23  ;;  %v348_v35 = vadd.f32 %v347_v33, %v868_v23  ;;  %v253_v36 = vpop.f32.mrb[23].mxu0  ;;  %v349_v37 = vpop.f32.mrb[23].mxu1 }
 0x14b   :  { %525 = vst [vmem:[#allocation7 + $0xa8] sm:$0xff] %v607_v30  ;;  %557 = vst [vmem:[#allocation7 + $0x1a8] sm:$0xff] %v639_v31  ;;  %v254_v38 = vadd.f32 %v253_v36, %v870_v24  ;;  %v350_v39 = vadd.f32 %v349_v37, %v870_v24 }
 0x14c   :  { %v608_v40 = vclamps-f32 %v252_v34, 1000.0  ;;  %v640_v41 = vclamps-f32 %v348_v35, 1000.0 }
 0x14d   :  { %v609_v42 = vclamps-f32 %v254_v38, 1000.0  ;;  %v641_v43 = vclamps-f32 %v350_v39, 1000.0  ;;  %v257_v44 = vpop.f32.mrb[24].mxu0  ;;  %v353_v45 = vpop.f32.mrb[24].mxu1 }
 0x14e   :  { %526 = vst [vmem:[#allocation7 + $0xb0] sm:$0xff] %v608_v40  ;;  %558 = vst [vmem:[#allocation7 + $0x1b0] sm:$0xff] %v640_v41  ;;  %v258_v46 = vadd.f32 %v257_v44, %v868_v23  ;;  %v354_v47 = vadd.f32 %v353_v45, %v868_v23  ;;  %v259_v48 = vpop.f32.mrb[25].mxu0  ;;  %v355_v49 = vpop.f32.mrb[25].mxu1 }
 0x14f   :  { %527 = vst [vmem:[#allocation7 + $0xb8] sm:$0xff] %v609_v42  ;;  %559 = vst [vmem:[#allocation7 + $0x1b8] sm:$0xff] %v641_v43  ;;  %v260_v50 = vadd.f32 %v259_v48, %v870_v24  ;;  %v356_v51 = vadd.f32 %v355_v49, %v870_v24 }
 0x150   :  { %v610_v52 = vclamps-f32 %v258_v46, 1000.0  ;;  %v642_v53 = vclamps-f32 %v354_v47, 1000.0 }
 0x151   :  { %v611_v54 = vclamps-f32 %v260_v50, 1000.0  ;;  %v643_v55 = vclamps-f32 %v356_v51, 1000.0  ;;  %v263_v56 = vpop.f32.mrb[26].mxu0  ;;  %v359_v57 = vpop.f32.mrb[26].mxu1 }
 0x152   :  { %528 = vst [vmem:[#allocation7 + $0xc0] sm:$0xff] %v610_v52  ;;  %560 = vst [vmem:[#allocation7 + $0x1c0] sm:$0xff] %v642_v53  ;;  %v264_v58 = vadd.f32 %v263_v56, %v868_v23  ;;  %v360_v59 = vadd.f32 %v359_v57, %v868_v23  ;;  %v265_v60 = vpop.f32.mrb[27].mxu0  ;;  %v361_v61 = vpop.f32.mrb[27].mxu1 }
 0x153   :  { %529 = vst [vmem:[#allocation7 + $0xc8] sm:$0xff] %v611_v54  ;;  %561 = vst [vmem:[#allocation7 + $0x1c8] sm:$0xff] %v643_v55  ;;  %v266_v62 = vadd.f32 %v265_v60, %v870_v24  ;;  %v362_v63 = vadd.f32 %v361_v61, %v870_v24 }
 0x154   :  { %v612_v1 = vclamps-f32 %v264_v58, 1000.0  ;;  %v644_v2 = vclamps-f32 %v360_v59, 1000.0 }
 0x155   :  { %v613_v3 = vclamps-f32 %v266_v62, 1000.0  ;;  %v645_v4 = vclamps-f32 %v362_v63, 1000.0  ;;  %v269_v5 = vpop.f32.mrb[28].mxu0  ;;  %v365_v6 = vpop.f32.mrb[28].mxu1 }
 0x156   :  { %530 = vst [vmem:[#allocation7 + $0xd0] sm:$0xff] %v612_v1  ;;  %562 = vst [vmem:[#allocation7 + $0x1d0] sm:$0xff] %v644_v2  ;;  %v270_v7 = vadd.f32 %v269_v5, %v868_v23  ;;  %v366_v8 = vadd.f32 %v365_v6, %v868_v23  ;;  %v271_v9 = vpop.f32.mrb[29].mxu0  ;;  %v367_v10 = vpop.f32.mrb[29].mxu1 }
 0x157   :  { %531 = vst [vmem:[#allocation7 + $0xd8] sm:$0xff] %v613_v3  ;;  %563 = vst [vmem:[#allocation7 + $0x1d8] sm:$0xff] %v645_v4  ;;  %v272_v11 = vadd.f32 %v271_v9, %v870_v24  ;;  %v368_v12 = vadd.f32 %v367_v10, %v870_v24 }
 0x158   :  { %v614_v13 = vclamps-f32 %v270_v7, 1000.0  ;;  %v646_v14 = vclamps-f32 %v366_v8, 1000.0 }
 0x159   :  { %v615_v15 = vclamps-f32 %v272_v11, 1000.0  ;;  %v647_v16 = vclamps-f32 %v368_v12, 1000.0  ;;  %v275_v17 = vpop.f32.mrb[30].mxu0  ;;  %v371_v18 = vpop.f32.mrb[30].mxu1 }
 0x15a   :  { %532 = vst [vmem:[#allocation7 + $0xe0] sm:$0xff] %v614_v13  ;;  %564 = vst [vmem:[#allocation7 + $0x1e0] sm:$0xff] %v646_v14  ;;  %v276_v19 = vadd.f32 %v275_v17, %v868_v23  ;;  %v372_v20 = vadd.f32 %v371_v18, %v868_v23  ;;  %v277_v21 = vpop.f32.mrb[31].mxu0  ;;  %v373_v22 = vpop.f32.mrb[31].mxu1 }
 0x15b   :  { %533 = vst [vmem:[#allocation7 + $0xe8] sm:$0xff] %v615_v15  ;;  %565 = vst [vmem:[#allocation7 + $0x1e8] sm:$0xff] %v647_v16  ;;  %v278_v25 = vadd.f32 %v277_v21, %v870_v24  ;;  %v374_v26 = vadd.f32 %v373_v22, %v870_v24 }
 0x15c   :  { %v616_v0 = vclamps-f32 %v276_v19, 1000.0  ;;  %v648_v27 = vclamps-f32 %v372_v20, 1000.0 }
 0x15d   :  { %v617_v28 = vclamps-f32 %v278_v25, 1000.0  ;;  %v649_v29 = vclamps-f32 %v374_v26, 1000.0 }
 0x15e   :  { %534 = vst [vmem:[#allocation7 + $0xf0] sm:$0xff] %v616_v0  ;;  %566 = vst [vmem:[#allocation7 + $0x1f0] sm:$0x3] %v648_v27 }
 0x15f   :  { %535 = vst [vmem:[#allocation7 + $0xf8] sm:$0xff] %v617_v28  ;;  %567 = vst [vmem:[#allocation7 + $0x1f8] sm:$0x3] %v649_v29 }
 0x160   :  { %761 = shalt.err (!%p758_p6)
}
 0x161   :  { %s762_s17 = scalar_lea.hbm %s954_s3, 8192 }
 0x162   :  { %p763_p7 = scmp.ne.s32.totalorder %s954_s3, %s762_s17  ;;  %p766_p8 = scmp.lt.u32.totalorder %s762_s17, %s954_s3 }
 0x164   :  { %p768_p9 = pnand %p766_p8, %p763_p7 }
 0x166   :  { %771 = shalt.err (!%p768_p9)
}
 0x167   :  { %579 = dma.vmem_to_hbm [thread:$0]  %s574_s13, 8192, %s954_s3, [#allocation4], %s782_s0, %s782_s0, %s783_s9  }
 0x168   :  { %776 = dma.done.wait [#allocation4], 8192  }
 0x169   :  { %777 = vsyncadd [#allocation4], 4294959104 }
 0x16a   :  { %583 = vsyncpa [#allocation3], 1 }
 0x16b   :  { %584 = vsyncpa [#allocation6], 1 }
 0x16c   :  { %585 = vsyncpa [#allocation4], 1 }

</bundles_post_ra>
